<compile_context>
chip_gen: v5e
topology: v5e:2x2
jax: 0.10.0
libtpu: 0.0.40
codegen_flags: <defaults>
</compile_context>

<pallas_src>
import functools

import jax
import jax.numpy as jnp
from jax.experimental import pallas as pl
from jax.experimental.pallas import tpu as pltpu


def _adain_block_kernel(x_ref, w_ref, style_ref, o_ref, *, up, eps):
    # x_ref:     (B, Cin, Lin)       native torch NCL block
    # w_ref:     (3*Cin + 1, Cout)   [tap-1 ; tap0 ; tap+1 ; bias] rows
    # style_ref: (B, 2, Cout)        [:,0,:]=style mean, [:,1,:]=style std
    # o_ref:     (B, Cout, Lout)     native torch NCL output block
    B, Cin, Lin = x_ref.shape
    Cout = o_ref.shape[1]
    Lout = o_ref.shape[2]

    x = x_ref[...].astype(jnp.float32)                       # (B, Cin, Lin)

    if up:
        # nn.Upsample(scale_factor=2, mode='nearest') along L, done in VMEM via a
        # 0/1 selection matmul (MXU) -- avoids interleave reshapes entirely.
        x2 = x.reshape(B * Cin, Lin)                          # merge leading dims
        row = jax.lax.broadcasted_iota(jnp.int32, (Lin, 2 * Lin), 0)
        col = jax.lax.broadcasted_iota(jnp.int32, (Lin, 2 * Lin), 1)
        up_mat = (col // 2 == row).astype(jnp.float32)        # (Lin, 2*Lin)
        x = jnp.dot(x2, up_mat,
                    preferred_element_type=jnp.float32).reshape(B, Cin, 2 * Lin)

    # NCL -> NLC inside VMEM so Cout=128 fills the lane dim for the conv matmul.
    xt = jnp.transpose(x, (0, 2, 1))                          # (B, Lout, Cin)

    # im2col for kernel=3, padding=1: columns are [x[l-1], x[l], x[l+1], 1].
    zrow = jnp.zeros((B, 1, Cin), jnp.float32)
    left = jnp.concatenate([zrow, xt[:, :Lout - 1, :]], axis=1)   # x[l-1] (zero pad)
    right = jnp.concatenate([xt[:, 1:, :], zrow], axis=1)         # x[l+1] (zero pad)
    ones = jnp.ones((B, Lout, 1), jnp.float32)                    # bias column
    xi = jnp.concatenate([left, xt, right, ones], axis=-1)        # (B, Lout, 3*Cin+1)

    # One fused MXU push for all 3 taps + bias.
    h = jnp.dot(xi.reshape(B * Lout, 3 * Cin + 1), w_ref[...],
                preferred_element_type=jnp.float32)               # (B*Lout, Cout)
    # ReLU; Dropout(p=0.0) is the identity.
    h = jnp.maximum(h, 0.0).reshape(B, Lout, Cout)

    # AdaIN: per-(sample, channel) instance stats over L.
    mean = jnp.mean(h, axis=1, keepdims=True)                     # (B, 1, Cout)
    # torch .var(dim=2) is unbiased (ddof=1); for Lout == 1 this is inf like torch.
    var = jnp.sum((h - mean) ** 2, axis=1, keepdims=True) / (Lout - 1) + eps
    inv_std = jax.lax.rsqrt(var)                                  # EUP
    smean = style_ref[:, 0:1, :]                                  # (B, 1, Cout)
    sstd = style_ref[:, 1:2, :]
    out = (h - mean) * inv_std * sstd + smean                     # (B, Lout, Cout)

    # Write back in the PyTorch NCL layout (VMEM transpose; no extra HBM pass).
    o_ref[...] = jnp.transpose(out, (0, 2, 1)).astype(o_ref.dtype)


def adain_block_forward(x, z, w, b, *, up=False, eps=1e-5):
    """AdaINBlock.forward.

    x: (N, Cin, L)    float32, torch NCL conv layout
    z: (N, 256)       style vector; z[:, :128] = mean, z[:, 128:] = std
    w: (Cout, Cin, 3) torch Conv1d weight layout
    b: (Cout,)        torch Conv1d bias
    """
    N, Cin, L = x.shape
    Cout = w.shape[0]
    assert Cout == 128, "adain slices z at 128, so out_ch must be 128"
    assert z.shape == (N, 2 * Cout)
    Lout = 2 * L if up else L

    # Batch several samples per grid step so each step does >= ~2K rows of work
    # (largest divisor of N not exceeding the cap).
    cap = max(1, 2048 // max(Lout, 1))
    B = max(d for d in range(1, N + 1) if N % d == 0 and d <= cap)
    grid = (N // B,)

    # Fold the 3 conv taps + bias into one (3*Cin+1, Cout) contraction matrix.
    # Row order matches the im2col column order: [tap-1 | tap0 | tap+1 | bias].
    w_k = jnp.transpose(w, (2, 1, 0)).reshape(3 * Cin, Cout)       # (3*Cin, Cout)
    w_cat = jnp.concatenate([w_k, b.reshape(1, Cout)], axis=0)     # (3*Cin+1, Cout)

    # Single style tensor: [:, 0, :] = mean, [:, 1, :] = std.
    style = z.reshape(N, 2, Cout)

    flops = 2 * N * Lout * (3 * Cin + 1) * Cout
    if up:
        flops += 2 * N * Cin * L * Lout
    bytes_accessed = 4 * (x.size + w_cat.size + style.size + N * Cout * Lout)
    cost = pl.CostEstimate(flops=flops, transcendentals=N * Cout,
                           bytes_accessed=bytes_accessed)

    return pl.pallas_call(
        functools.partial(_adain_block_kernel, up=up, eps=eps),
        out_shape=jax.ShapeDtypeStruct((N, Cout, Lout), x.dtype),
        grid_spec=pltpu.PrefetchScalarGridSpec(
            num_scalar_prefetch=0,
            grid=grid,
            in_specs=[
                pl.BlockSpec((B, Cin, L), lambda i: (i, 0, 0)),
                pl.BlockSpec((3 * Cin + 1, Cout), lambda i: (0, 0)),
                pl.BlockSpec((B, 2, Cout), lambda i: (i, 0, 0)),
            ],
            out_specs=pl.BlockSpec((B, Cout, Lout), lambda i: (i, 0, 0)),
        ),
        compiler_params=pltpu.CompilerParams(
            dimension_semantics=("parallel",)),
        cost_estimate=cost,
    )(x, w_cat, style)


def _reference(x, z, w, b, *, up=False, eps=1e-5):
    """Pure-JAX reference mirroring the PyTorch forward."""
    if up:
        x = jnp.repeat(x, 2, axis=-1)
    h = jax.lax.conv_general_dilated(
        x, w, window_strides=(1,), padding=((1, 1),),
        dimension_numbers=("NCH", "OIH", "NCH"))
    h = jnp.maximum(h + b[None, :, None], 0.0)
    mean = h.mean(axis=2, keepdims=True)
    std = jnp.sqrt(h.var(axis=2, ddof=1, keepdims=True) + eps)
    norm = (h - mean) / std
    return norm * z[:, 128:][:, :, None] + z[:, :128][:, :, None]


if __name__ == "__main__":
    N, Cin, L, Cout = 2, 32, 16, 128

    key = jax.random.PRNGKey(0)
    kx, kz, kw, kb = jax.random.split(key, 4)
    x = jax.random.normal(kx, (N, Cin, L), dtype=jnp.float32)
    z = jax.random.normal(kz, (N, 2 * Cout), dtype=jnp.float32)
    # deterministic synthetic parameters (torch Conv1d weight/bias shapes)
    w = 0.1 * jax.random.normal(kw, (Cout, Cin, 3), dtype=jnp.float32)
    b = 0.1 * jax.random.normal(kb, (Cout,), dtype=jnp.float32)

    for up in (False, True):
        out = adain_block_forward(x, z, w, b, up=up)
        jax.block_until_ready(out)
        ref = _reference(x, z, w, b, up=up)
        assert out.shape == ref.shape, (out.shape, ref.shape)
        err = float(jnp.max(jnp.abs(out - ref)))
        assert err < 1e-3, err

    print("KERNEL_OK")
</pallas_src>

<mosaic_0001>
module attributes {stable_mosaic.version = 11 : i64} {
  func.func @_adain_block_kernel(%arg0: i32, %arg1: memref<2x32x16xf32, #tpu.memory_space<vmem>>, %arg2: memref<97x128xf32, #tpu.memory_space<vmem>>, %arg3: memref<2x2x128xf32, #tpu.memory_space<vmem>>, %arg4: memref<2x128x16xf32, #tpu.memory_space<vmem>>) attributes {dimension_semantics = [#tpu.dimension_semantics<parallel>], iteration_bounds = array<i64: 1>, scalar_prefetch = 0 : i64, scratch_operands = 0 : i64, tpu.core_type = #tpu.core_type<tc>, window_params = [{transform_indices = @transform_0, window_bounds = array<i64: 2, 32, 16>}, {pipeline_mode = #tpu.pipeline_mode<synchronous>, transform_indices = @transform_1, window_bounds = array<i64: 97, 128>}, {transform_indices = @transform_2, window_bounds = array<i64: 2, 2, 128>}, {transform_indices = @transform_3, window_bounds = array<i64: 2, 128, 16>}]} {
    %c0 = arith.constant 0 : index
    %c0_0 = arith.constant 0 : index
    %c0_1 = arith.constant 0 : index
    %0 = vector.load %arg1[%c0, %c0_0, %c0_1] : memref<2x32x16xf32, #tpu.memory_space<vmem>>, vector<2x32x16xf32>
    %1 = tpu.transpose %0, [0, 2, 1] : vector<2x32x16xf32> -> vector<2x16x32xf32>
    %cst = arith.constant 0.000000e+00 : f32
    %2 = vector.broadcast %cst : f32 to vector<2x1x32xf32>
    %3 = vector.extract_strided_slice %1 {offsets = [0, 0, 0], sizes = [2, 15, 32], strides = [1, 1, 1]} : vector<2x16x32xf32> to vector<2x15x32xf32>
    %4 = tpu.concatenate %2, %3 in 1 : vector<2x1x32xf32>, vector<2x15x32xf32> -> vector<2x16x32xf32>
    %5 = vector.extract_strided_slice %1 {offsets = [0, 1, 0], sizes = [2, 15, 32], strides = [1, 1, 1]} : vector<2x16x32xf32> to vector<2x15x32xf32>
    %6 = tpu.concatenate %5, %2 in 1 : vector<2x15x32xf32>, vector<2x1x32xf32> -> vector<2x16x32xf32>
    %cst_2 = arith.constant 1.000000e+00 : f32
    %7 = vector.broadcast %cst_2 : f32 to vector<2x16x1xf32>
    %8 = tpu.concatenate %4, %1, %6, %7 in 2 : vector<2x16x32xf32>, vector<2x16x32xf32>, vector<2x16x32xf32>, vector<2x16x1xf32> -> vector<2x16x97xf32>
    %9 = vector.shape_cast %8 : vector<2x16x97xf32> to vector<32x97xf32>
    %c0_3 = arith.constant 0 : index
    %c0_4 = arith.constant 0 : index
    %10 = vector.load %arg2[%c0_3, %c0_4] : memref<97x128xf32, #tpu.memory_space<vmem>>, vector<97x128xf32>
    %cst_5 = arith.constant dense<0.000000e+00> : vector<32x128xf32>
    %11 = tpu.matmul %9, %10, %cst_5 {dimension_numbers = #tpu.dot_dimension_numbers<[1], [0], [0], [1], [0, 0, 1, 1], [], []>} : vector<32x97xf32>, vector<97x128xf32>, vector<32x128xf32> -> vector<32x128xf32>
    %cst_6 = arith.constant 0.000000e+00 : f32
    %12 = vector.broadcast %cst_6 : f32 to vector<32x128xf32>
    %13 = arith.maximumf %11, %12 : vector<32x128xf32>
    %14 = vector.shape_cast %13 : vector<32x128xf32> to vector<2x16x128xf32>
    %cst_7 = arith.constant dense<0.000000e+00> : vector<2x128xf32>
    %15 = vector.multi_reduction <add>, %14, %cst_7 [1] : vector<2x16x128xf32> to vector<2x128xf32>
    %16 = vector.shape_cast %15 : vector<2x128xf32> to vector<2x1x128xf32>
    %cst_8 = arith.constant 1.600000e+01 : f32
    %17 = vector.broadcast %cst_8 : f32 to vector<2x1x128xf32>
    %18 = arith.divf %16, %17 : vector<2x1x128xf32>
    %19 = vector.broadcast %18 : vector<2x1x128xf32> to vector<2x16x128xf32>
    %20 = arith.subf %14, %19 : vector<2x16x128xf32>
    %21 = arith.mulf %20, %20 : vector<2x16x128xf32>
    %cst_9 = arith.constant dense<0.000000e+00> : vector<2x128xf32>
    %22 = vector.multi_reduction <add>, %21, %cst_9 [1] : vector<2x16x128xf32> to vector<2x128xf32>
    %23 = vector.shape_cast %22 : vector<2x128xf32> to vector<2x1x128xf32>
    %cst_10 = arith.constant 1.500000e+01 : f32
    %24 = vector.broadcast %cst_10 : f32 to vector<2x1x128xf32>
    %25 = arith.divf %23, %24 : vector<2x1x128xf32>
    %cst_11 = arith.constant 9.99999974E-6 : f32
    %26 = vector.broadcast %cst_11 : f32 to vector<2x1x128xf32>
    %27 = arith.addf %25, %26 : vector<2x1x128xf32>
    %28 = math.rsqrt %27 : vector<2x1x128xf32>
    %c0_12 = arith.constant 0 : index
    %c0_13 = arith.constant 0 : index
    %c0_14 = arith.constant 0 : index
    %29 = vector.load %arg3[%c0_12, %c0_13, %c0_14] : memref<2x2x128xf32, #tpu.memory_space<vmem>>, vector<2x1x128xf32>
    %c0_15 = arith.constant 0 : index
    %c1 = arith.constant 1 : index
    %c0_16 = arith.constant 0 : index
    %30 = vector.load %arg3[%c0_15, %c1, %c0_16] : memref<2x2x128xf32, #tpu.memory_space<vmem>>, vector<2x1x128xf32>
    %31 = vector.broadcast %18 : vector<2x1x128xf32> to vector<2x16x128xf32>
    %32 = arith.subf %14, %31 : vector<2x16x128xf32>
    %33 = vector.broadcast %28 : vector<2x1x128xf32> to vector<2x16x128xf32>
    %34 = arith.mulf %32, %33 : vector<2x16x128xf32>
    %35 = vector.broadcast %30 : vector<2x1x128xf32> to vector<2x16x128xf32>
    %36 = arith.mulf %34, %35 : vector<2x16x128xf32>
    %37 = vector.broadcast %29 : vector<2x1x128xf32> to vector<2x16x128xf32>
    %38 = arith.addf %36, %37 : vector<2x16x128xf32>
    %39 = tpu.transpose %38, [0, 2, 1] : vector<2x16x128xf32> -> vector<2x128x16xf32>
    %c0_17 = arith.constant 0 : index
    %c0_18 = arith.constant 0 : index
    %c0_19 = arith.constant 0 : index
    %40 = vector.load %arg4[%c0_17, %c0_18, %c0_19] : memref<2x128x16xf32, #tpu.memory_space<vmem>>, vector<2x128x16xf32>
    tpu.vector_store %arg4[%c0_17, %c0_18, %c0_19], %39 {strides = array<i32>} : memref<2x128x16xf32, #tpu.memory_space<vmem>>, vector<2x128x16xf32>,
    return
  }
  func.func @transform_0(%arg0: i32) -> (i32, i32, i32) {
    %c0_i32 = arith.constant 0 : i32
    %c0_i32_0 = arith.constant 0 : i32
    %c0_i32_1 = arith.constant 0 : i32
    return %arg0, %c0_i32, %c0_i32_0 : i32, i32, i32
  }
  func.func @transform_1(%arg0: i32) -> (i32, i32) {
    %c0_i32 = arith.constant 0 : i32
    %c0_i32_0 = arith.constant 0 : i32
    %c0_i32_1 = arith.constant 0 : i32
    return %c0_i32, %c0_i32_0 : i32, i32
  }
  func.func @transform_2(%arg0: i32) -> (i32, i32, i32) {
    %c0_i32 = arith.constant 0 : i32
    %c0_i32_0 = arith.constant 0 : i32
    %c0_i32_1 = arith.constant 0 : i32
    return %arg0, %c0_i32, %c0_i32_0 : i32, i32, i32
  }
  func.func @transform_3(%arg0: i32) -> (i32, i32, i32) {
    %c0_i32 = arith.constant 0 : i32
    %c0_i32_0 = arith.constant 0 : i32
    %c0_i32_1 = arith.constant 0 : i32
    return %arg0, %c0_i32, %c0_i32_0 : i32, i32, i32
  }
}

</mosaic_0001>

<bundles_post_ra>
// kernel: tpu_custom_call.1
= control target key start
LH: loop header
LB: loop body
LE: loop exit
PB: predicated region body
PF: predicated region fallthrough
CT: control target
= control target key end

     0   :  { %8 = vsyncpa [#allocation3], 0  ;;  %s521_s15 = smov [#allocation2]   ;;  %s522_s17 = smov 128   ;;  %s755_s0 = inlined_call_operand.vmem [shape: f32[2,32,16], index: 0, kind: input, shape index: {}]   ;;  %s756_s1 = inlined_call_operand.hbm [shape: f32[97,128], index: 1, kind: input, shape index: {}]   ;;  %s757_s2 = inlined_call_operand.vmem [shape: f32[2,2,128], index: 2, kind: input, shape index: {}]   ;;  %s758_s3 = inlined_call_operand.vmem [shape: f32[2,128,16], index: 3, kind: output, shape index: {}]  }
   0x1   :  { %s15_s14 = sshll.u32 %s756_s1, 4  ;;  %s17_s16 = sshll.u32 %s521_s15, 4  ;;  %s16_s14 = int_to_ptr.hbm [resolvable:$true] %s15_s14  ;;  %s18_s16 = int_to_ptr.vmem [resolvable:$true] %s17_s16 }
   0x2   :  { %s523_s18 = smov 8  }
   0x3   :  { %23 = dma.hbm_to_vmem [thread:$0]  %s16_s14, 1664, %s18_s16, [#allocation3], %s522_s17, %s522_s17, %s523_s18  }
   0x4   :  { %519 = dma.done.wait [#allocation3], 1664  }
   0x5   :  { %520 = vsyncadd [#allocation3], 4294965632  ;;  %v34_v0 = vld [vmem:[%s755_s0 + $0x20] sm:$0xff]  ;;  %v35_v2 = vld [vmem:[%s755_s0 + $0x28] sm:$0xff]  ;;  %vm106_vm0 = vcmask 1040384   ;;  %s524_s7 = smov 32  }
   0x6   :  { %v30_v1 = vld [vmem:[%s755_s0] sm:$0xff]  ;;  %70 = vxpose.xlu0.b32.start [1/4] (short) (narrow) %v34_v0, 16  ;;  %v31_v3 = vld [vmem:[%s755_s0 + $0x8] sm:$0xff]  ;;  %v36_v4 = vld [vmem:[%s755_s0 + $0x30] sm:$0xff]  ;;  %vm119_vm1 = vcmask 1046528   ;;  %vm156_vm2 = vcmask 261120  }
   0x7   :  { %38 = vxpose.xlu1.b32.start [1/4] (short) (narrow) %v30_v1, 16  ;;  %v32_v5 = vld [vmem:[%s755_s0 + $0x10] sm:$0xff]  ;;  %v37_v6 = vld [vmem:[%s755_s0 + $0x38] sm:$0xff]  ;;  %v183_v18 = vld [vmem:[#allocation2 + $0x60] sm:$0x1]  ;;  %vm161_vm3 = vcmask 523264  }
   0x8   :  { %v33_v7 = vld [vmem:[%s755_s0 + $0x18] sm:$0xff]  ;;  %437 = vmatpush.msk.msra.mxu2 %vm106_vm0, %v183_v18  ;;  %438 = vmatpush.msk.msra.mxu3 %vm106_vm0, %v183_v18  ;;  %v181_v20 = vld [vmem:[#allocation2 + $0x50] sm:$0xff]  ;;  %v180_v24 = vld [vmem:[#allocation2 + $0x48] sm:$0xff]  ;;  %s525_s0 = smov 64   ;;  %vm166_vm4 = vcmask 785408   ;;  %vm184_vm5 = vcmask 793600  }
   0x9   :  { %v182_v19 = vld [vmem:[#allocation2 + $0x58] sm:$0xff]  ;;  %431 = vmatpush.msk.msra.mxu0 %vm106_vm0, %v183_v18  ;;  %436 = vmatpush.msk.msra.mxu1 %vm106_vm0, %v183_v18  ;;  %v179_v32 = vld [vmem:[#allocation2 + $0x40] sm:$0xff]  ;;  %v177_v34 = vld [vmem:[#allocation2 + $0x30] sm:$0xff]  ;;  %v526_v61 = vmov 16.0   ;;  %vm393_vm14 = vcmask 130048  }
   0xa   :  { %440 = vmatpush.msra.mxu2 %v182_v19  ;;  %441 = vmatpush.msra.mxu3 %v182_v19  ;;  %v178_v33 = vld [vmem:[#allocation2 + $0x38] sm:$0xff]  ;;  %v176_v35 = vld [vmem:[#allocation2 + $0x28] sm:$0xff]  ;;  %v175_v36 = vld [vmem:[#allocation2 + $0x20] sm:$0xff]  ;;  %487 = vrcp.f32 %v526_v61 }
   0xb   :  { %204 = vmatpush.msra.mxu0 %v182_v19  ;;  %439 = vmatpush.msra.mxu1 %v182_v19  ;;  %v174_v37 = vld [vmem:[#allocation2 + $0x18] sm:$0xff]  ;;  %v173_v38 = vld [vmem:[#allocation2 + $0x10] sm:$0xff]  ;;  %v172_v39 = vld [vmem:[#allocation2 + $0x8] sm:$0xff] }
   0xc   :  { %443 = vmatpush.msra.mxu2 %v181_v20  ;;  %444 = vmatpush.msra.mxu3 %v181_v20  ;;  %v171_v40 = vld [vmem:[#allocation2] sm:$0xff] }
   0xd   :  { %205 = vmatpush.msra.mxu0 %v181_v20  ;;  %442 = vmatpush.msra.mxu1 %v181_v20 }
   0xe   :  { %71 = vxpose.xlu0.b32.cont [2/4] (short) (narrow) %v35_v2, 16  ;;  %446 = vmatpush.msra.mxu2 %v180_v24 }
   0xf   :  { %39 = vxpose.xlu1.b32.cont [2/4] (short) (narrow) %v31_v3, 16  ;;  %447 = vmatpush.msra.mxu3 %v180_v24 }
  0x10   :  { %206 = vmatpush.msra.mxu0 %v180_v24  ;;  %445 = vmatpush.msra.mxu1 %v180_v24  ;;  %v488_v62 = vpop.eup %487 }
  0x11   :  { %449 = vmatpush.msra.mxu2 %v179_v32  ;;  %450 = vmatpush.msra.mxu3 %v179_v32  ;;  %v248_v0 = vmul.f32 16.0, %v488_v62  ;;  %vm252_vm6 = vweird.f32 %v488_v62 }
  0x12   :  { %207 = vmatpush.msra.mxu0 %v179_v32  ;;  %448 = vmatpush.msra.mxu1 %v179_v32 }
  0x13   :  { %452 = vmatpush.msra.mxu2 %v178_v33  ;;  %453 = vmatpush.msra.mxu3 %v178_v33 }
  0x14   :  { %208 = vmatpush.msra.mxu0 %v178_v33  ;;  %451 = vmatpush.msra.mxu1 %v178_v33 }
  0x15   :  { %455 = vmatpush.msra.mxu2 %v177_v34  ;;  %456 = vmatpush.msra.mxu3 %v177_v34 }
  0x16   :  { %72 = vxpose.xlu0.b32.cont [3/4] (short) (narrow) %v36_v4, 16  ;;  %209 = vmatpush.msra.mxu0 %v177_v34  ;;  %v249_v4 = vsub.f32 1.0, %v248_v0 }
  0x17   :  { %40 = vxpose.xlu1.b32.cont [3/4] (short) (narrow) %v32_v5, 16  ;;  %454 = vmatpush.msra.mxu1 %v177_v34 }
  0x18   :  { %458 = vmatpush.msra.mxu2 %v176_v35  ;;  %459 = vmatpush.msra.mxu3 %v176_v35 }
  0x19   :  { %210 = vmatpush.msra.mxu0 %v176_v35  ;;  %457 = vmatpush.msra.mxu1 %v176_v35 }
  0x1a   :  { %461 = vmatpush.msra.mxu2 %v175_v36  ;;  %462 = vmatpush.msra.mxu3 %v175_v36 }
  0x1b   :  { %211 = vmatpush.msra.mxu0 %v175_v36  ;;  %460 = vmatpush.msra.mxu1 %v175_v36 }
  0x1c   :  { %464 = vmatpush.msra.mxu2 %v174_v37  ;;  %465 = vmatpush.msra.mxu3 %v174_v37 }
  0x1d   :  { %212 = vmatpush.msra.mxu0 %v174_v37  ;;  %463 = vmatpush.msra.mxu1 %v174_v37 }
  0x1e   :  { %73 = vxpose.xlu0.b32.end [4/4] (short) (narrow) %v37_v6, 16  ;;  %467 = vmatpush.msra.mxu2 %v173_v38 }
  0x1f   :  { %41 = vxpose.xlu1.b32.end [4/4] (short) (narrow) %v33_v7, 16  ;;  %468 = vmatpush.msra.mxu3 %v173_v38  ;;  %v250_v7 = vmul.f32 %v488_v62, %v249_v4 }
  0x20   :  { %213 = vmatpush.msra.mxu0 %v173_v38  ;;  %466 = vmatpush.msra.mxu1 %v173_v38 }
  0x21   :  { %470 = vmatpush.msra.mxu2 %v172_v39  ;;  %471 = vmatpush.msra.mxu3 %v172_v39 }
  0x22   :  { %214 = vmatpush.msra.mxu0 %v172_v39  ;;  %469 = vmatpush.msra.mxu1 %v172_v39 }
  0x23   :  { %473 = vmatpush.msra.mxu2 %v171_v40  ;;  %474 = vmatpush.msra.mxu3 %v171_v40 }
  0x24   :  { %215 = vmatpush.msra.mxu0 %v171_v40  ;;  %472 = vmatpush.msra.mxu1 %v171_v40 }
  0xaa   :  { %v86_v8 = vpop.trf.xlu0 }
  0xab   :  { %v54_v9 = vpop.trf.xlu1  ;;  %v110_v10 = vrot.slane %v86_v8, 7  ;;  %134 = vrot.lane.b32.xlu2 %v86_v8, %s524_s7  ;;  %v123_v25 = vrot.slane %v86_v8, 1 }
  0xac   :  { %v107_v11 = vrot.slane %v54_v9, 7  ;;  %130 = vrot.lane.b32.xlu0 %v54_v9, %s524_s7  ;;  %v120_v28 = vrot.slane %v54_v9, 1 }
  0xad   :  { %v576_v12 = vsel %vm106_vm0, 0.0, %v110_v10 }
  0xae   :  { %v579_v13 = vsel %vm106_vm0, 0.0, %v107_v11 }
  0xb2   :  { %v87_v14 = vpop.trf.xlu0 }
  0xb3   :  { %v55_v15 = vpop.trf.xlu1  ;;  %v111_v16 = vrot.slane %v87_v14, 7  ;;  %136 = vrot.lane.b32.xlu2 %v87_v14, %s524_s7  ;;  %v124_v21 = vrot.slane %v87_v14, 1 }
  0xb4   :  { %v108_v17 = vrot.slane %v55_v15, 7  ;;  %132 = vrot.lane.b32.xlu1 %v55_v15, %s524_s7  ;;  %v121_v29 = vrot.slane %v55_v15, 1 }
  0xb5   :  { %v586_v22 = vsel %vm106_vm0, %v110_v10, %v111_v16  ;;  %v125_v26 = vsel %vm119_vm1, %v123_v25, %v124_v21  ;;  %v129_v27 = vsel %vm119_vm1, %v124_v21, 0.0 }
  0xb6   :  { %v589_v23 = vsel %vm106_vm0, %v107_v11, %v108_v17  ;;  %v122_v30 = vsel %vm119_vm1, %v120_v28, %v121_v29  ;;  %v128_v31 = vsel %vm119_vm1, %v121_v29, 0.0  ;;  %v527_v11 = vmov 15.0  }
  0xb7   :  { %489 = vrcp.f32 %v527_v11 }
  0xbb   :  { %148 = vrot.lane.b32.xlu2 %v125_v26, %s525_s0 }
  0xbd   :  { %v490_v20 = vpop.eup %489 }
  0xbe   :  { %v279_v25 = vmul.f32 15.0, %v490_v20  ;;  %vm283_vm7 = vweird.f32 %v490_v20 }
  0xc0   :  { %v280_v32 = vsub.f32 1.0, %v279_v25 }
  0xc2   :  { %v281_v37 = vmul.f32 %v490_v20, %v280_v32 }
  0xc3   :  { %150 = vrot.lane.b32.xlu2 %v129_v27, %s525_s0 }
  0xcb   :  { %144 = vrot.lane.b32.xlu2 %v122_v30, %s525_s0 }
  0xd3   :  { %146 = vrot.lane.b32.xlu2 %v128_v31, %s525_s0 }
 0x105   :  { %v135_v41 = vpop.permute.xlu2 %134 }
 0x106   :  { %v159_v43 = vsel %vm156_vm2, %v576_v12, %v135_v41  ;;  %v251_v12 = vadd.f32 %v488_v62, %v250_v7 }
 0x108   :  { %v253_v19 = vsel %vm252_vm6, %v488_v62, %v251_v12  ;;  %v483_v12 = vld [vmem:[%s757_s2 + $0x1] ss:$0 sm:$0xff] }
 0x10d   :  { %v137_v42 = vpop.permute.xlu2 %136 }
 0x10e   :  { %v160_v47 = vsel %vm156_vm2, %v586_v22, %v137_v42 }
 0x115   :  { %v149_v44 = vpop.permute.xlu2 %148 }
 0x116   :  { %v164_v45 = vsel %vm161_vm3, %v159_v43, %v149_v44  ;;  %v282_v43 = vadd.f32 %v490_v20, %v281_v37 }
 0x117   :  { %v169_v46 = vsel %vm166_vm4, %v164_v45, 1.0 }
 0x118   :  { %434 = vmatmul.msk.f32.vlgmr.msra.gmra.mxu2 %vm184_vm5, %v169_v46 }
 0x11d   :  { %v151_v48 = vpop.permute.xlu2 %150 }
 0x11e   :  { %v165_v49 = vsel %vm161_vm3, %v160_v47, %v151_v48  ;;  %v131_v51 = vpop.permute.xlu0 %130 }
 0x11f   :  { %v170_v50 = vsel %vm166_vm4, %v165_v49, 1.0  ;;  %v157_v52 = vsel %vm156_vm2, %v579_v13, %v131_v51  ;;  %v284_v49 = vsel %vm283_vm7, %v490_v20, %v282_v43 }
 0x120   :  { %435 = vmatmul.msk.f32.vlgmr.msra.gmra.mxu3 %vm184_vm5, %v170_v50 }
 0x125   :  { %v145_v53 = vpop.permute.xlu2 %144 }
 0x126   :  { %v162_v54 = vsel %vm161_vm3, %v157_v52, %v145_v53  ;;  %v133_v56 = vpop.permute.xlu1 %132 }
 0x127   :  { %v167_v55 = vsel %vm166_vm4, %v162_v54, 1.0  ;;  %v158_v57 = vsel %vm156_vm2, %v589_v23, %v133_v56 }
 0x128   :  { %432 = vmatmul.msk.f32.vlgmr.msra.gmra.mxu0 %vm184_vm5, %v167_v55 }
 0x12d   :  { %v147_v58 = vpop.permute.xlu2 %146 }
 0x12e   :  { %v163_v59 = vsel %vm161_vm3, %v158_v57, %v147_v58 }
 0x12f   :  { %v168_v60 = vsel %vm166_vm4, %v163_v59, 1.0 }
 0x130   :  { %433 = vmatmul.msk.f32.vlgmr.msra.gmra.mxu1 %vm184_vm5, %v168_v60 }
 0x19b   :  { %v223_v63 = vpop.f32.mrf.mxu2 }
 0x19c   :  { %v231_v2 = vmax.f32 %v223_v63, 0.0 }
 0x1a3   :  { %v226_v1 = vpop.f32.mrf.mxu3 }
 0x1a4   :  { %v232_v3 = vmax.f32 %v226_v1, 0.0 }
 0x1a5   :  { %v217_v9 = vpop.f32.mrf.mxu0 }
 0x1a6   :  { %v240_v5 = vadd.f32 %v232_v3, %v231_v2  ;;  %v229_v15 = vmax.f32 %v217_v9, 0.0 }
 0x1a8   :  { %v241_v6 = vrot.slane %v240_v5, 4 }
 0x1aa   :  { %v242_v8 = vadd.f32 %v241_v6, %v240_v5 }
 0x1ac   :  { %v243_v10 = vrot.slane %v242_v8, 2 }
 0x1ad   :  { %v220_v13 = vpop.f32.mrf.mxu1 }
 0x1ae   :  { %v244_v14 = vadd.f32 %v243_v10, %v242_v8  ;;  %v230_v16 = vmax.f32 %v220_v13, 0.0 }
 0x1b0   :  { %v245_v17 = vrot.slane %v244_v14, 1  ;;  %v233_v18 = vadd.f32 %v230_v16, %v229_v15 }
 0x1b2   :  { %v246_v21 = vadd.f32 %v245_v17, %v244_v14  ;;  %v234_v22 = vrot.slane %v233_v18, 4 }
 0x1b4   :  { %v255_v23 = vmul.f32 %v253_v19, %v246_v21  ;;  %v235_v24 = vadd.f32 %v234_v22, %v233_v18  ;;  %v485_v21 = vld [vmem:[%s757_s2 + $0x3] ss:$0 sm:$0xff] }
 0x1b6   :  { %v258_v26 = vsub.f32 %v231_v2, %v255_v23  ;;  %v259_v27 = vsub.f32 %v232_v3, %v255_v23  ;;  %v236_v28 = vrot.slane %v235_v24, 2  ;;  %v486_v23 = vld [vmem:[%s757_s2 + $0x2] ss:$0 sm:$0xff] }
 0x1b8   :  { %v262_v29 = vmul.f32 %v258_v26, %v258_v26  ;;  %v263_v30 = vmul.f32 %v259_v27, %v259_v27  ;;  %v237_v31 = vadd.f32 %v236_v28, %v235_v24 }
 0x1ba   :  { %v271_v33 = vadd.f32 %v263_v30, %v262_v29  ;;  %v238_v34 = vrot.slane %v237_v31, 1 }
 0x1bc   :  { %v272_v35 = vrot.slane %v271_v33, 4  ;;  %v239_v36 = vadd.f32 %v238_v34, %v237_v31 }
 0x1be   :  { %v273_v38 = vadd.f32 %v272_v35, %v271_v33  ;;  %v254_v39 = vmul.f32 %v253_v19, %v239_v36 }
 0x1c0   :  { %v274_v40 = vrot.slane %v273_v38, 2  ;;  %v256_v41 = vsub.f32 %v229_v15, %v254_v39  ;;  %v257_v42 = vsub.f32 %v230_v16, %v254_v39  ;;  %v484_v15 = vld [vmem:[%s757_s2] ss:$0 sm:$0xff] }
 0x1c2   :  { %v275_v44 = vadd.f32 %v274_v40, %v273_v38  ;;  %v260_v45 = vmul.f32 %v256_v41, %v256_v41  ;;  %v261_v46 = vmul.f32 %v257_v42, %v257_v42 }
 0x1c4   :  { %v276_v47 = vrot.slane %v275_v44, 1  ;;  %v264_v48 = vadd.f32 %v261_v46, %v260_v45 }
 0x1c6   :  { %v277_v50 = vadd.f32 %v276_v47, %v275_v44  ;;  %v265_v51 = vrot.slane %v264_v48, 4 }
 0x1c8   :  { %v286_v52 = vmul.f32 %v284_v49, %v277_v50  ;;  %v266_v53 = vadd.f32 %v265_v51, %v264_v48 }
 0x1ca   :  { %v288_v54 = vadd.f32 1e-05, %v286_v52  ;;  %v267_v55 = vrot.slane %v266_v53, 2 }
 0x1cc   :  { %491 = vrsqrt.f32 %v288_v54  ;;  %v268_v56 = vadd.f32 %v267_v55, %v266_v53  ;;  %vm305_vm9 = vweird.f32 %v288_v54 }
 0x1ce   :  { %v269_v57 = vrot.slane %v268_v56, 1 }
 0x1d0   :  { %v270_v58 = vadd.f32 %v269_v57, %v268_v56 }
 0x1d2   :  { %v492_v59 = vpop.eup %491  ;;  %v285_v60 = vmul.f32 %v284_v49, %v270_v58 }
 0x1d3   :  { %v300_v61 = vmul.f32 %v492_v59, %v288_v54  ;;  %vm306_vm8 = vweird.f32 %v492_v59 }
 0x1d4   :  { %v287_v62 = vadd.f32 1e-05, %v285_v60  ;;  %vm307_vm10 = vmor %vm305_vm9, %vm306_vm8 }
 0x1d5   :  { %v301_v63 = vmul.f32 %v492_v59, %v300_v61 }
 0x1d6   :  { %493 = vrsqrt.f32 %v287_v62  ;;  %vm295_vm12 = vweird.f32 %v287_v62 }
 0x1d7   :  { %v302_v0 = vmul.f32 0.5, %v301_v63 }
 0x1d9   :  { %v303_v1 = vsub.f32 1.5, %v302_v0 }
 0x1db   :  { %v304_v2 = vmul.f32 %v492_v59, %v303_v1 }
 0x1dc   :  { %v494_v3 = vpop.eup %493 }
 0x1dd   :  { %v308_v4 = vsel %vm307_vm10, %v492_v59, %v304_v2  ;;  %v290_v5 = vmul.f32 %v494_v3, %v287_v62  ;;  %vm296_vm11 = vweird.f32 %v494_v3 }
 0x1de   :  { %v316_v6 = vmul.f32 %v308_v4, %v259_v27  ;;  %v315_v7 = vmul.f32 %v308_v4, %v258_v26  ;;  %vm297_vm13 = vmor %vm295_vm12, %vm296_vm11 }
 0x1df   :  { %v291_v8 = vmul.f32 %v494_v3, %v290_v5 }
 0x1e0   :  { %v321_v22 = vmul.f32 %v485_v21, %v315_v7  ;;  %v322_v25 = vmul.f32 %v485_v21, %v316_v6 }
 0x1e1   :  { %v292_v9 = vmul.f32 0.5, %v291_v8 }
 0x1e2   :  { %v327_v24 = vadd.f32 %v486_v23, %v321_v22  ;;  %v328_v26 = vadd.f32 %v486_v23, %v322_v25 }
 0x1e3   :  { %v293_v10 = vsub.f32 1.5, %v292_v9 }
 0x1e5   :  { %v294_v11 = vmul.f32 %v494_v3, %v293_v10 }
 0x1e7   :  { %v298_v13 = vsel %vm297_vm13, %v494_v3, %v294_v11 }
 0x1e8   :  { %v313_v14 = vmul.f32 %v298_v13, %v256_v41  ;;  %v314_v17 = vmul.f32 %v298_v13, %v257_v42 }
 0x1ea   :  { %v319_v16 = vmul.f32 %v483_v12, %v313_v14  ;;  %v320_v19 = vmul.f32 %v483_v12, %v314_v17 }
 0x1ec   :  { %v325_v18 = vadd.f32 %v484_v15, %v319_v16  ;;  %v326_v20 = vadd.f32 %v484_v15, %v320_v19 }
 0x1ee   :  { %329 = vxpose.xlu2.b32.start [1/2] (short) %v325_v18, 128 }
 0x1f6   :  { %330 = vxpose.xlu2.b32.end [2/2] (short) %v326_v20, 128 }
 0x26e   :  { %361 = vxpose.xlu2.b32.start [1/2] (short) %v327_v24, 128 }
 0x276   :  { %362 = vxpose.xlu2.b32.end [2/2] (short) %v328_v26, 128 }
 0x287   :  { %v345_v27 = vpop.trf.xlu2 }
 0x288   :  { %394 = vst.msk [vmem:[%s758_s3] sm:$0xff] %vm393_vm14, %v345_v27 }
 0x28f   :  { %v346_v28 = vpop.trf.xlu2 }
 0x290   :  { %395 = vst.msk [vmem:[%s758_s3 + $0x8] sm:$0xff] %vm393_vm14, %v346_v28 }
 0x297   :  { %v347_v29 = vpop.trf.xlu2 }
 0x298   :  { %396 = vst.msk [vmem:[%s758_s3 + $0x10] sm:$0xff] %vm393_vm14, %v347_v29 }
 0x29f   :  { %v348_v30 = vpop.trf.xlu2 }
 0x2a0   :  { %397 = vst.msk [vmem:[%s758_s3 + $0x18] sm:$0xff] %vm393_vm14, %v348_v30 }
 0x2a7   :  { %v349_v31 = vpop.trf.xlu2 }
 0x2a8   :  { %398 = vst.msk [vmem:[%s758_s3 + $0x20] sm:$0xff] %vm393_vm14, %v349_v31 }
 0x2af   :  { %v350_v32 = vpop.trf.xlu2 }
 0x2b0   :  { %399 = vst.msk [vmem:[%s758_s3 + $0x28] sm:$0xff] %vm393_vm14, %v350_v32 }
 0x2b7   :  { %v351_v33 = vpop.trf.xlu2 }
 0x2b8   :  { %400 = vst.msk [vmem:[%s758_s3 + $0x30] sm:$0xff] %vm393_vm14, %v351_v33 }
 0x2bf   :  { %v352_v34 = vpop.trf.xlu2 }
 0x2c0   :  { %401 = vst.msk [vmem:[%s758_s3 + $0x38] sm:$0xff] %vm393_vm14, %v352_v34 }
 0x2c7   :  { %v353_v35 = vpop.trf.xlu2 }
 0x2c8   :  { %402 = vst.msk [vmem:[%s758_s3 + $0x40] sm:$0xff] %vm393_vm14, %v353_v35 }
 0x2cf   :  { %v354_v36 = vpop.trf.xlu2 }
 0x2d0   :  { %403 = vst.msk [vmem:[%s758_s3 + $0x48] sm:$0xff] %vm393_vm14, %v354_v36 }
 0x2d7   :  { %v355_v37 = vpop.trf.xlu2 }
 0x2d8   :  { %404 = vst.msk [vmem:[%s758_s3 + $0x50] sm:$0xff] %vm393_vm14, %v355_v37 }
 0x2df   :  { %v356_v38 = vpop.trf.xlu2 }
 0x2e0   :  { %405 = vst.msk [vmem:[%s758_s3 + $0x58] sm:$0xff] %vm393_vm14, %v356_v38 }
 0x2e7   :  { %v357_v39 = vpop.trf.xlu2 }
 0x2e8   :  { %406 = vst.msk [vmem:[%s758_s3 + $0x60] sm:$0xff] %vm393_vm14, %v357_v39 }
 0x2ef   :  { %v358_v40 = vpop.trf.xlu2 }
 0x2f0   :  { %407 = vst.msk [vmem:[%s758_s3 + $0x68] sm:$0xff] %vm393_vm14, %v358_v40 }
 0x2f7   :  { %v359_v41 = vpop.trf.xlu2 }
 0x2f8   :  { %408 = vst.msk [vmem:[%s758_s3 + $0x70] sm:$0xff] %vm393_vm14, %v359_v41 }
 0x2ff   :  { %v360_v42 = vpop.trf.xlu2 }
 0x300   :  { %409 = vst.msk [vmem:[%s758_s3 + $0x78] sm:$0xff] %vm393_vm14, %v360_v42 }
 0x307   :  { %v377_v43 = vpop.trf.xlu2 }
 0x308   :  { %410 = vst.msk [vmem:[%s758_s3 + $0x80] sm:$0xff] %vm393_vm14, %v377_v43 }
 0x30f   :  { %v378_v44 = vpop.trf.xlu2 }
 0x310   :  { %411 = vst.msk [vmem:[%s758_s3 + $0x88] sm:$0xff] %vm393_vm14, %v378_v44 }
 0x317   :  { %v379_v45 = vpop.trf.xlu2 }
 0x318   :  { %412 = vst.msk [vmem:[%s758_s3 + $0x90] sm:$0xff] %vm393_vm14, %v379_v45 }
 0x31f   :  { %v380_v46 = vpop.trf.xlu2 }
 0x320   :  { %413 = vst.msk [vmem:[%s758_s3 + $0x98] sm:$0xff] %vm393_vm14, %v380_v46 }
 0x327   :  { %v381_v47 = vpop.trf.xlu2 }
 0x328   :  { %414 = vst.msk [vmem:[%s758_s3 + $0xa0] sm:$0xff] %vm393_vm14, %v381_v47 }
 0x32f   :  { %v382_v48 = vpop.trf.xlu2 }
 0x330   :  { %415 = vst.msk [vmem:[%s758_s3 + $0xa8] sm:$0xff] %vm393_vm14, %v382_v48 }
 0x337   :  { %v383_v49 = vpop.trf.xlu2 }
 0x338   :  { %416 = vst.msk [vmem:[%s758_s3 + $0xb0] sm:$0xff] %vm393_vm14, %v383_v49 }
 0x33f   :  { %v384_v50 = vpop.trf.xlu2 }
 0x340   :  { %417 = vst.msk [vmem:[%s758_s3 + $0xb8] sm:$0xff] %vm393_vm14, %v384_v50 }
 0x347   :  { %v385_v51 = vpop.trf.xlu2 }
 0x348   :  { %418 = vst.msk [vmem:[%s758_s3 + $0xc0] sm:$0xff] %vm393_vm14, %v385_v51 }
 0x34f   :  { %v386_v52 = vpop.trf.xlu2 }
 0x350   :  { %419 = vst.msk [vmem:[%s758_s3 + $0xc8] sm:$0xff] %vm393_vm14, %v386_v52 }
 0x357   :  { %v387_v53 = vpop.trf.xlu2 }
 0x358   :  { %420 = vst.msk [vmem:[%s758_s3 + $0xd0] sm:$0xff] %vm393_vm14, %v387_v53 }
 0x35f   :  { %v388_v54 = vpop.trf.xlu2 }
 0x360   :  { %421 = vst.msk [vmem:[%s758_s3 + $0xd8] sm:$0xff] %vm393_vm14, %v388_v54 }
 0x367   :  { %v389_v55 = vpop.trf.xlu2 }
 0x368   :  { %422 = vst.msk [vmem:[%s758_s3 + $0xe0] sm:$0xff] %vm393_vm14, %v389_v55 }
 0x36f   :  { %v390_v56 = vpop.trf.xlu2 }
 0x370   :  { %423 = vst.msk [vmem:[%s758_s3 + $0xe8] sm:$0xff] %vm393_vm14, %v390_v56 }
 0x377   :  { %v391_v57 = vpop.trf.xlu2 }
 0x378   :  { %424 = vst.msk [vmem:[%s758_s3 + $0xf0] sm:$0xff] %vm393_vm14, %v391_v57 }
 0x37f   :  { %v392_v58 = vpop.trf.xlu2 }
 0x380   :  { %425 = vst.msk [vmem:[%s758_s3 + $0xf8] sm:$0xff] %vm393_vm14, %v392_v58 }
 0x381   :  { %430 = vsyncpa [#allocation3], 1 }

</bundles_post_ra>
